<compile_context>
chip_gen: v7x
topology: tpu7x:2x2x1
jax: 0.10.0
libtpu: 0.0.40
codegen_flags: <defaults>
</compile_context>

<pallas_src>
import jax
import jax.numpy as jnp
from jax.experimental import pallas as pl
from jax.experimental.pallas import tpu as pltpu


def _self_attention_kernel(v_ref, k_ref, q_ref,
                           wv_ref, wk_ref, wq_ref,
                           wo_ref, bo_ref,
                           o_ref,
                           acc_ref):
    """Grid = (batch_blocks, heads).  One step: one head of Nb batch elements.

    v_ref/k_ref/q_ref : (Nb, L, D)  bf16 input slice of this head (head dim
                                    squeezed out by the BlockSpec)
    wv/wk/wq_ref      : (D, D)      bf16 per-head weights, pre-transposed
                                    (wq also pre-scaled by 1/sqrt(embed_size))
    wo_ref            : (D, E)      bf16 rows h*D:(h+1)*D of fc_out.weight.T
    bo_ref            : (1, 1, E)   f32 fc_out bias
    o_ref             : (Nb, L, E)  output block (constant index over heads)
    acc_ref           : (Nb, L, E)  f32 accumulator over the head axis
    """
    h = pl.program_id(1)
    nb, L, D = q_ref.shape
    E = o_ref.shape[-1]

    @pl.when(h == 0)
    def _():
        acc_ref[...] = jnp.zeros_like(acc_ref)

    # Per-head projections: (Nb*L, D) x (D, D), bf16 operands -> f32 accumulate.
    v = jnp.dot(v_ref[...].reshape(nb * L, D), wv_ref[...],
                preferred_element_type=jnp.float32)
    k = jnp.dot(k_ref[...].reshape(nb * L, D), wk_ref[...],
                preferred_element_type=jnp.float32)
    q = jnp.dot(q_ref[...].reshape(nb * L, D), wq_ref[...],
                preferred_element_type=jnp.float32)   # 1/sqrt(E) folded into wq

    # Attention for this head, batched over the Nb batch rows (leading batch dim).
    qb = q.reshape(nb, L, D).astype(jnp.bfloat16)
    kb = k.reshape(nb, L, D).astype(jnp.bfloat16)
    vb = v.reshape(nb, L, D).astype(jnp.bfloat16)
    energy = jnp.einsum('bqd,bkd->bqk', qb, kb,
                        preferred_element_type=jnp.float32)        # (Nb, L, L) f32
    m = jnp.max(energy, axis=-1, keepdims=True)
    p = jnp.exp(energy - m)                                        # f32 softmax
    denom = jnp.sum(p, axis=-1, keepdims=True)
    attn = p * pl.reciprocal(denom, approx=True)                   # EUP slot
    ctx = jnp.einsum('bqk,bkd->bqd', attn.astype(jnp.bfloat16), vb,
                     preferred_element_type=jnp.float32)           # (Nb, L, D)

    # This head's fc_out contribution: (Nb*L, D) x (D, E) -> lane-dense (Nb, L, E).
    contrib = jnp.dot(ctx.reshape(nb * L, D).astype(jnp.bfloat16), wo_ref[...],
                      preferred_element_type=jnp.float32)
    acc_ref[...] += contrib.reshape(nb, L, E)

    @pl.when(h == pl.num_programs(1) - 1)
    def _():
        o_ref[...] = (acc_ref[...] + bo_ref[...]).astype(o_ref.dtype)


def _pick_batch_block(N, L, D, E, vmem_budget_bytes=12 * 1024 * 1024):
    """Largest per-step batch block that (a) leaves >=2 'parallel' grid steps
    when N >= 2 (so v7x's two TensorCores both get work) and (b) fits a VMEM
    budget: 3 bf16 inputs double-buffered + 2 output buffers + f32 accumulator.
    (Weights are head-invariant and O(E*D) -> negligible here.)"""
    def step_bytes(nb):
        return 3 * 2 * nb * L * D * 2 + 3 * nb * L * E * 4

    cap = max(1, N // 2) if N >= 2 else 1
    for nb in range(min(cap, N), 0, -1):
        if N % nb == 0 and step_bytes(nb) <= vmem_budget_bytes:
            return nb
    return 1


def self_attention(values, keys, query, wv, wk, wq, wo, bo):
    """values/keys/query: (N, L, H, D).  Returns (N, L, H*D) in the input dtype.

    Mirrors the PyTorch module: per-head Linear(D, D) projections (shared
    across heads, no bias), softmax(QK^T / sqrt(embed_size)), then fc_out.
    """
    N, L, H, D = query.shape
    E = H * D
    out_dtype = query.dtype
    scale = 1.0 / float(E) ** 0.5          # module divides energy by sqrt(embed_size)

    # ---- Host-side prep (layout plumbing + precision choice, done once). ----
    # nn.Linear convention y = x @ W.T: pre-transpose; fold the energy scale
    # into the query weight; present bf16 operands to the MXU.
    wv_t = wv.T.astype(jnp.bfloat16)                    # (D, D)
    wk_t = wk.T.astype(jnp.bfloat16)                    # (D, D)
    wq_t = (wq.T * scale).astype(jnp.bfloat16)          # (D, D), scale pre-folded
    wo_t = wo.T.reshape(H, D, E).astype(jnp.bfloat16)   # rows h*D:(h+1)*D of fc_out.weight.T
    bo3 = bo.reshape(1, 1, E).astype(jnp.float32)

    # Head-major layout so each grid step DMAs one head's rectangular
    # (Nb, L, D) tile (block last dims equal the full array dims -> no
    # (8,128) padding surprises, no in-kernel lane slicing).
    def to_head_major(x):
        return jnp.transpose(x, (0, 2, 1, 3)).astype(jnp.bfloat16)   # (N, H, L, D)

    vh, kh, qh = to_head_major(values), to_head_major(keys), to_head_major(query)

    nb = _pick_batch_block(N, L, D, E)
    n_blocks = N // nb

    in_block = pl.BlockSpec((nb, None, L, D), lambda i, h: (i, h, 0, 0))
    wd_block = pl.BlockSpec((D, D), lambda i, h: (0, 0))           # VMEM-resident
    wo_block = pl.BlockSpec((None, D, E), lambda i, h: (h, 0, 0))
    bo_block = pl.BlockSpec((1, 1, E), lambda i, h: (0, 0, 0))
    out_block = pl.BlockSpec((nb, L, E), lambda i, h: (i, 0, 0))   # resident over h

    return pl.pallas_call(
        _self_attention_kernel,
        out_shape=jax.ShapeDtypeStruct((N, L, E), out_dtype),
        grid_spec=pltpu.PrefetchScalarGridSpec(
            num_scalar_prefetch=0,
            grid=(n_blocks, H),                      # head (reduction) axis last
            in_specs=[in_block, in_block, in_block,
                      wd_block, wd_block, wd_block,
                      wo_block, bo_block],
            out_specs=out_block,
            scratch_shapes=[pltpu.VMEM((nb, L, E), jnp.float32)],
        ),
        compiler_params=pltpu.CompilerParams(
            dimension_semantics=("parallel", "arbitrary"),
            # Raise the scoped-VMEM limit explicitly (v5e defaults to 16 MiB);
            # the budget-derived `nb` keeps actual usage far below this.
            vmem_limit_bytes=32 * 1024 * 1024,
        ),
    )(vh, kh, qh, wv_t, wk_t, wq_t, wo_t, bo3)


def reference(values, keys, query, wv, wk, wq, wo, bo):
    """Pure-JAX (f32) mirror of the PyTorch forward, for the correctness check."""
    N, L, H, D = query.shape
    E = H * D
    v = jnp.einsum('nlhd,ed->nlhe', values, wv)
    k = jnp.einsum('nlhd,ed->nlhe', keys, wk)
    q = jnp.einsum('nlhd,ed->nlhe', query, wq)
    energy = jnp.einsum('nqhd,nkhd->nhqk', q, k)
    attn = jax.nn.softmax(energy / (E ** 0.5), axis=3)
    out = jnp.einsum('nhql,nlhd->nqhd', attn, v).reshape(N, L, E)
    return jnp.einsum('nqe,fe->nqf', out, wo) + bo


if __name__ == "__main__":
    # Small, module-consistent shapes: embed_size = 128, heads = 4 ->
    # head_dim = 32; batch = 2; seq = 8.
    N, L, H, D = 2, 8, 4, 32
    E = H * D

    key = jax.random.PRNGKey(0)
    kv_, kk_, kq_, kwv, kwk, kwq, kwo, kbo = jax.random.split(key, 8)

    values = jax.random.normal(kv_, (N, L, H, D), dtype=jnp.float32)
    keys_in = jax.random.normal(kk_, (N, L, H, D), dtype=jnp.float32)
    query = jax.random.normal(kq_, (N, L, H, D), dtype=jnp.float32)

    # Parameter shapes match nn.Linear weights: (out_features, in_features).
    wv = jax.random.normal(kwv, (D, D), dtype=jnp.float32) * 0.1
    wk = jax.random.normal(kwk, (D, D), dtype=jnp.float32) * 0.1
    wq = jax.random.normal(kwq, (D, D), dtype=jnp.float32) * 0.1
    wo = jax.random.normal(kwo, (E, E), dtype=jnp.float32) * 0.1
    bo = jax.random.normal(kbo, (E,), dtype=jnp.float32) * 0.1

    out = jax.block_until_ready(
        self_attention(values, keys_in, query, wv, wk, wq, wo, bo))
    ref = reference(values, keys_in, query, wv, wk, wq, wo, bo)

    assert out.shape == (N, L, E)
    # bf16 MXU operands and the EUP approximate reciprocal in the softmax
    # normalization are deliberate precision choices; the f32 reference is
    # matched to a few percent (use approx=False / f32 operands for tighter
    # parity with the PyTorch module).
    max_err = jnp.max(jnp.abs(out.astype(jnp.float32) - ref))
    assert jnp.allclose(out.astype(jnp.float32), ref, atol=3e-2, rtol=3e-2), (
        f"mismatch vs JAX reference (max abs err {max_err})")

    print("KERNEL_OK")
</pallas_src>

<mosaic_0001>
module attributes {stable_mosaic.version = 11 : i64} {
  func.func @_self_attention_kernel(%arg0: i32, %arg1: i32, %arg2: memref<1x1x8x32xbf16, #tpu.memory_space<vmem>>, %arg3: memref<1x1x8x32xbf16, #tpu.memory_space<vmem>>, %arg4: memref<1x1x8x32xbf16, #tpu.memory_space<vmem>>, %arg5: memref<32x32xbf16, #tpu.memory_space<vmem>>, %arg6: memref<32x32xbf16, #tpu.memory_space<vmem>>, %arg7: memref<32x32xbf16, #tpu.memory_space<vmem>>, %arg8: memref<1x32x128xbf16, #tpu.memory_space<vmem>>, %arg9: memref<1x1x128xf32, #tpu.memory_space<vmem>>, %arg10: memref<1x8x128xf32, #tpu.memory_space<vmem>>, %arg11: memref<1x8x128xf32, #tpu.memory_space<vmem>>) attributes {dimension_semantics = [#tpu.dimension_semantics<parallel>, #tpu.dimension_semantics<arbitrary>], iteration_bounds = array<i64: 2, 4>, scalar_prefetch = 0 : i64, scratch_operands = 1 : i64, tpu.core_type = #tpu.core_type<tc>, window_params = [{transform_indices = @transform_0, window_bounds = array<i64: 1, 1, 8, 32>}, {transform_indices = @transform_1, window_bounds = array<i64: 1, 1, 8, 32>}, {transform_indices = @transform_2, window_bounds = array<i64: 1, 1, 8, 32>}, {pipeline_mode = #tpu.pipeline_mode<synchronous>, transform_indices = @transform_3, window_bounds = array<i64: 32, 32>}, {pipeline_mode = #tpu.pipeline_mode<synchronous>, transform_indices = @transform_4, window_bounds = array<i64: 32, 32>}, {pipeline_mode = #tpu.pipeline_mode<synchronous>, transform_indices = @transform_5, window_bounds = array<i64: 32, 32>}, {transform_indices = @transform_6, window_bounds = array<i64: 1, 32, 128>}, {pipeline_mode = #tpu.pipeline_mode<synchronous>, transform_indices = @transform_7, window_bounds = array<i64: 1, 1, 128>}, {transform_indices = @transform_8, window_bounds = array<i64: 1, 8, 128>}]} {
    %c0_i32 = arith.constant 0 : i32
    %0 = arith.cmpi eq, %arg1, %c0_i32 : i32
    %1 = arith.extui %0 : i1 to i32
    %c0_i32_0 = arith.constant 0 : i32
    %2 = arith.cmpi ne, %1, %c0_i32_0 : i32
    scf.if %2 {
      %cst_35 = arith.constant 0.000000e+00 : f32
      %49 = vector.broadcast %cst_35 : f32 to vector<1x8x128xf32>
      %c0_36 = arith.constant 0 : index
      %c0_37 = arith.constant 0 : index
      %c0_38 = arith.constant 0 : index
      %50 = vector.load %arg11[%c0_36, %c0_37, %c0_38] : memref<1x8x128xf32, #tpu.memory_space<vmem>>, vector<1x8x128xf32>
      tpu.vector_store %arg11[%c0_36, %c0_37, %c0_38], %49 {strides = array<i32>} : memref<1x8x128xf32, #tpu.memory_space<vmem>>, vector<1x8x128xf32>,
    } else {
    }
    %c0 = arith.constant 0 : index
    %c0_1 = arith.constant 0 : index
    %c0_2 = arith.constant 0 : index
    %c0_3 = arith.constant 0 : index
    %3 = vector.load %arg2[%c0, %c0_1, %c0_2, %c0_3] : memref<1x1x8x32xbf16, #tpu.memory_space<vmem>>, vector<1x1x8x32xbf16>
    %4 = vector.shape_cast %3 : vector<1x1x8x32xbf16> to vector<1x8x32xbf16>
    %5 = vector.shape_cast %4 : vector<1x8x32xbf16> to vector<8x32xbf16>
    %c0_4 = arith.constant 0 : index
    %c0_5 = arith.constant 0 : index
    %6 = vector.load %arg5[%c0_4, %c0_5] : memref<32x32xbf16, #tpu.memory_space<vmem>>, vector<32x32xbf16>
    %cst = arith.constant dense<0.000000e+00> : vector<8x32xf32>
    %7 = tpu.matmul %5, %6, %cst {dimension_numbers = #tpu.dot_dimension_numbers<[1], [0], [0], [1], [0, 0, 1, 1], [], []>} : vector<8x32xbf16>, vector<32x32xbf16>, vector<8x32xf32> -> vector<8x32xf32>
    %c0_6 = arith.constant 0 : index
    %c0_7 = arith.constant 0 : index
    %c0_8 = arith.constant 0 : index
    %c0_9 = arith.constant 0 : index
    %8 = vector.load %arg3[%c0_6, %c0_7, %c0_8, %c0_9] : memref<1x1x8x32xbf16, #tpu.memory_space<vmem>>, vector<1x1x8x32xbf16>
    %9 = vector.shape_cast %8 : vector<1x1x8x32xbf16> to vector<1x8x32xbf16>
    %10 = vector.shape_cast %9 : vector<1x8x32xbf16> to vector<8x32xbf16>
    %c0_10 = arith.constant 0 : index
    %c0_11 = arith.constant 0 : index
    %11 = vector.load %arg6[%c0_10, %c0_11] : memref<32x32xbf16, #tpu.memory_space<vmem>>, vector<32x32xbf16>
    %cst_12 = arith.constant dense<0.000000e+00> : vector<8x32xf32>
    %12 = tpu.matmul %10, %11, %cst_12 {dimension_numbers = #tpu.dot_dimension_numbers<[1], [0], [0], [1], [0, 0, 1, 1], [], []>} : vector<8x32xbf16>, vector<32x32xbf16>, vector<8x32xf32> -> vector<8x32xf32>
    %c0_13 = arith.constant 0 : index
    %c0_14 = arith.constant 0 : index
    %c0_15 = arith.constant 0 : index
    %c0_16 = arith.constant 0 : index
    %13 = vector.load %arg4[%c0_13, %c0_14, %c0_15, %c0_16] : memref<1x1x8x32xbf16, #tpu.memory_space<vmem>>, vector<1x1x8x32xbf16>
    %14 = vector.shape_cast %13 : vector<1x1x8x32xbf16> to vector<1x8x32xbf16>
    %15 = vector.shape_cast %14 : vector<1x8x32xbf16> to vector<8x32xbf16>
    %c0_17 = arith.constant 0 : index
    %c0_18 = arith.constant 0 : index
    %16 = vector.load %arg7[%c0_17, %c0_18] : memref<32x32xbf16, #tpu.memory_space<vmem>>, vector<32x32xbf16>
    %cst_19 = arith.constant dense<0.000000e+00> : vector<8x32xf32>
    %17 = tpu.matmul %15, %16, %cst_19 {dimension_numbers = #tpu.dot_dimension_numbers<[1], [0], [0], [1], [0, 0, 1, 1], [], []>} : vector<8x32xbf16>, vector<32x32xbf16>, vector<8x32xf32> -> vector<8x32xf32>
    %18 = vector.shape_cast %17 : vector<8x32xf32> to vector<1x8x32xf32>
    %19 = arith.truncf %18 : vector<1x8x32xf32> to vector<1x8x32xbf16>
    %20 = vector.shape_cast %12 : vector<8x32xf32> to vector<1x8x32xf32>
    %21 = arith.truncf %20 : vector<1x8x32xf32> to vector<1x8x32xbf16>
    %22 = vector.shape_cast %7 : vector<8x32xf32> to vector<1x8x32xf32>
    %23 = arith.truncf %22 : vector<1x8x32xf32> to vector<1x8x32xbf16>
    "tpu.trace_start"() <{level = 10 : i32, message = "bqd,bkd->bqk"}> : () -> ()
    %cst_20 = arith.constant dense<0.000000e+00> : vector<1x8x8xf32>
    %24 = tpu.matmul %19, %21, %cst_20 {dimension_numbers = #tpu.dot_dimension_numbers<[2], [2], [1], [1], [0, 0, 0, 1, 1, 1], [0], [0]>} : vector<1x8x32xbf16>, vector<1x8x32xbf16>, vector<1x8x8xf32> -> vector<1x8x8xf32>
    "tpu.trace_stop"() : () -> ()
    %cst_21 = arith.constant dense<0xFF800000> : vector<1x8xf32>
    %25 = vector.multi_reduction <maximumf>, %24, %cst_21 [2] : vector<1x8x8xf32> to vector<1x8xf32>
    %26 = vector.shape_cast %25 : vector<1x8xf32> to vector<1x8x1xf32>
    %27 = vector.broadcast %26 : vector<1x8x1xf32> to vector<1x8x8xf32>
    %28 = arith.subf %24, %27 : vector<1x8x8xf32>
    %29 = math.exp %28 : vector<1x8x8xf32>
    %cst_22 = arith.constant dense<0.000000e+00> : vector<1x8xf32>
    %30 = vector.multi_reduction <add>, %29, %cst_22 [2] : vector<1x8x8xf32> to vector<1x8xf32>
    %31 = vector.shape_cast %30 : vector<1x8xf32> to vector<1x8x1xf32>
    %32 = tpu.reciprocal %31 {approx = true} : vector<1x8x1xf32> -> vector<1x8x1xf32>
    %33 = vector.broadcast %32 : vector<1x8x1xf32> to vector<1x8x8xf32>
    %34 = arith.mulf %29, %33 : vector<1x8x8xf32>
    %35 = arith.truncf %34 : vector<1x8x8xf32> to vector<1x8x8xbf16>
    "tpu.trace_start"() <{level = 10 : i32, message = "bqk,bkd->bqd"}> : () -> ()
    %cst_23 = arith.constant dense<0.000000e+00> : vector<1x8x32xf32>
    %36 = tpu.matmul %35, %23, %cst_23 {dimension_numbers = #tpu.dot_dimension_numbers<[2], [1], [1], [2], [0, 0, 0, 1, 1, 2], [0], [0]>} : vector<1x8x8xbf16>, vector<1x8x32xbf16>, vector<1x8x32xf32> -> vector<1x8x32xf32>
    "tpu.trace_stop"() : () -> ()
    %37 = vector.shape_cast %36 : vector<1x8x32xf32> to vector<8x32xf32>
    %38 = arith.truncf %37 : vector<8x32xf32> to vector<8x32xbf16>
    %c0_24 = arith.constant 0 : index
    %c0_25 = arith.constant 0 : index
    %c0_26 = arith.constant 0 : index
    %39 = vector.load %arg8[%c0_24, %c0_25, %c0_26] : memref<1x32x128xbf16, #tpu.memory_space<vmem>>, vector<1x32x128xbf16>
    %40 = vector.shape_cast %39 : vector<1x32x128xbf16> to vector<32x128xbf16>
    %cst_27 = arith.constant dense<0.000000e+00> : vector<8x128xf32>
    %41 = tpu.matmul %38, %40, %cst_27 {dimension_numbers = #tpu.dot_dimension_numbers<[1], [0], [0], [1], [0, 0, 1, 1], [], []>} : vector<8x32xbf16>, vector<32x128xbf16>, vector<8x128xf32> -> vector<8x128xf32>
    %c0_28 = arith.constant 0 : index
    %c0_29 = arith.constant 0 : index
    %c0_30 = arith.constant 0 : index
    %42 = vector.load %arg11[%c0_28, %c0_29, %c0_30] : memref<1x8x128xf32, #tpu.memory_space<vmem>>, vector<1x8x128xf32>
    %43 = vector.shape_cast %41 : vector<8x128xf32> to vector<1x8x128xf32>
    %44 = arith.addf %42, %43 : vector<1x8x128xf32>
    %c0_31 = arith.constant 0 : index
    %c0_32 = arith.constant 0 : index
    %c0_33 = arith.constant 0 : index
    %45 = vector.load %arg11[%c0_31, %c0_32, %c0_33] : memref<1x8x128xf32, #tpu.memory_space<vmem>>, vector<1x8x128xf32>
    tpu.vector_store %arg11[%c0_31, %c0_32, %c0_33], %44 {strides = array<i32>} : memref<1x8x128xf32, #tpu.memory_space<vmem>>, vector<1x8x128xf32>,
    %c3_i32 = arith.constant 3 : i32
    %46 = arith.cmpi eq, %arg1, %c3_i32 : i32
    %47 = arith.extui %46 : i1 to i32
    %c0_i32_34 = arith.constant 0 : i32
    %48 = arith.cmpi ne, %47, %c0_i32_34 : i32
    scf.if %48 {
      %c0_35 = arith.constant 0 : index
      %c0_36 = arith.constant 0 : index
      %c0_37 = arith.constant 0 : index
      %49 = vector.load %arg11[%c0_35, %c0_36, %c0_37] : memref<1x8x128xf32, #tpu.memory_space<vmem>>, vector<1x8x128xf32>
      %c0_38 = arith.constant 0 : index
      %c0_39 = arith.constant 0 : index
      %c0_40 = arith.constant 0 : index
      %50 = vector.load %arg9[%c0_38, %c0_39, %c0_40] : memref<1x1x128xf32, #tpu.memory_space<vmem>>, vector<1x1x128xf32>
      %51 = vector.broadcast %50 : vector<1x1x128xf32> to vector<1x8x128xf32>
      %52 = arith.addf %49, %51 : vector<1x8x128xf32>
      %c0_41 = arith.constant 0 : index
      %c0_42 = arith.constant 0 : index
      %c0_43 = arith.constant 0 : index
      %53 = vector.load %arg10[%c0_41, %c0_42, %c0_43] : memref<1x8x128xf32, #tpu.memory_space<vmem>>, vector<1x8x128xf32>
      tpu.vector_store %arg10[%c0_41, %c0_42, %c0_43], %52 {strides = array<i32>} : memref<1x8x128xf32, #tpu.memory_space<vmem>>, vector<1x8x128xf32>,
    } else {
    }
    return
  }
  func.func @transform_0(%arg0: i32, %arg1: i32) -> (i32, i32, i32, i32) {
    %c0_i32 = arith.constant 0 : i32
    %c0_i32_0 = arith.constant 0 : i32
    %c0_i32_1 = arith.constant 0 : i32
    return %arg0, %arg1, %c0_i32, %c0_i32_0 : i32, i32, i32, i32
  }
  func.func @transform_1(%arg0: i32, %arg1: i32) -> (i32, i32, i32, i32) {
    %c0_i32 = arith.constant 0 : i32
    %c0_i32_0 = arith.constant 0 : i32
    %c0_i32_1 = arith.constant 0 : i32
    return %arg0, %arg1, %c0_i32, %c0_i32_0 : i32, i32, i32, i32
  }
  func.func @transform_2(%arg0: i32, %arg1: i32) -> (i32, i32, i32, i32) {
    %c0_i32 = arith.constant 0 : i32
    %c0_i32_0 = arith.constant 0 : i32
    %c0_i32_1 = arith.constant 0 : i32
    return %arg0, %arg1, %c0_i32, %c0_i32_0 : i32, i32, i32, i32
  }
  func.func @transform_3(%arg0: i32, %arg1: i32) -> (i32, i32) {
    %c0_i32 = arith.constant 0 : i32
    %c0_i32_0 = arith.constant 0 : i32
    %c0_i32_1 = arith.constant 0 : i32
    return %c0_i32, %c0_i32_0 : i32, i32
  }
  func.func @transform_4(%arg0: i32, %arg1: i32) -> (i32, i32) {
    %c0_i32 = arith.constant 0 : i32
    %c0_i32_0 = arith.constant 0 : i32
    %c0_i32_1 = arith.constant 0 : i32
    return %c0_i32, %c0_i32_0 : i32, i32
  }
  func.func @transform_5(%arg0: i32, %arg1: i32) -> (i32, i32) {
    %c0_i32 = arith.constant 0 : i32
    %c0_i32_0 = arith.constant 0 : i32
    %c0_i32_1 = arith.constant 0 : i32
    return %c0_i32, %c0_i32_0 : i32, i32
  }
  func.func @transform_6(%arg0: i32, %arg1: i32) -> (i32, i32, i32) {
    %c0_i32 = arith.constant 0 : i32
    %c0_i32_0 = arith.constant 0 : i32
    %c0_i32_1 = arith.constant 0 : i32
    return %arg1, %c0_i32, %c0_i32_0 : i32, i32, i32
  }
  func.func @transform_7(%arg0: i32, %arg1: i32) -> (i32, i32, i32) {
    %c0_i32 = arith.constant 0 : i32
    %c0_i32_0 = arith.constant 0 : i32
    %c0_i32_1 = arith.constant 0 : i32
    %c0_i32_2 = arith.constant 0 : i32
    return %c0_i32, %c0_i32_0, %c0_i32_1 : i32, i32, i32
  }
  func.func @transform_8(%arg0: i32, %arg1: i32) -> (i32, i32, i32) {
    %c0_i32 = arith.constant 0 : i32
    %c0_i32_0 = arith.constant 0 : i32
    %c0_i32_1 = arith.constant 0 : i32
    return %arg0, %c0_i32, %c0_i32_0 : i32, i32, i32
  }
}

</mosaic_0001>

<bundles_post_ra>
// kernel: tpu_custom_call.1
= control target key start
LH: loop header
LB: loop body
LE: loop exit
PB: predicated region body
PF: predicated region fallthrough
CT: control target
= control target key end

     0   :  { %s2258_s0 = inlined_call_operand.hbm [shape: bf16[2,4,8,32], index: 0, kind: input, shape index: {}]   ;;  %s2259_s1 = inlined_call_operand.hbm [shape: bf16[2,4,8,32], index: 1, kind: input, shape index: {}]   ;;  %s2260_s2 = inlined_call_operand.hbm [shape: bf16[2,4,8,32], index: 2, kind: input, shape index: {}]   ;;  %s2261_s3 = inlined_call_operand.hbm [shape: bf16[32,32], index: 3, kind: input, shape index: {}]   ;;  %s2262_s4 = inlined_call_operand.hbm [shape: bf16[32,32], index: 4, kind: input, shape index: {}]   ;;  %s2263_s5 = inlined_call_operand.vmem [shape: bf16[32,32], index: 5, kind: input, shape index: {}]   ;;  %s2264_s6 = inlined_call_operand.hbm [shape: bf16[4,32,128], index: 6, kind: input, shape index: {}]   ;;  %s2265_s7 = inlined_call_operand.vmem [shape: f32[1,1,128], index: 7, kind: input, shape index: {}]   ;;  %s2266_s8 = inlined_call_operand.hbm [shape: f32[2,8,128], index: 8, kind: output, shape index: {}]  }
   0x1   :  { %2302 = sst [smem:[#allocation36_spill]] %s2259_s1 }
   0x2   :  { %2303 = sst [smem:[#allocation37_spill]] %s2261_s3 }
   0x3   :  { %2304 = sst [smem:[#allocation38_spill]] %s2262_s4 }
   0x4   :  { %2305 = sst [smem:[#allocation39_spill]] %s2263_s5 }
   0x5   :  { %2306 = sst [smem:[#allocation40_spill]] %s2265_s7 }
   0x6   :  { %2307 = sst [smem:[#allocation41_spill]] %s2266_s8 }
   0x7   :  { %13 = vsyncpa [#allocation4], 0 }
   0x8   :  { %15 = vsyncpa [#allocation4 + $0x1], 0 }
   0x9   :  { %16 = vsyncpa [#allocation7], 0 }
   0xa   :  { %18 = vsyncpa [#allocation7 + $0x1], 0 }
   0xb   :  { %19 = vsyncpa [#allocation10], 0 }
   0xc   :  { %20 = vsyncpa [#allocation13], 0 }
   0xd   :  { %22 = vsyncpa [#allocation13 + $0x1], 0 }
   0xe   :  { %23 = vsyncpa [#allocation5], 0 }
   0xf   :  { %25 = vsyncpa [#allocation5 + $0x1], 0  ;;  %s1724_s27 = smov 0   ;;  %s1726_s28 = smov 0  }
  0x10   :  { %s1728_s29 = smov 0   ;;  %s1730_s30 = smov 0  }
  0x11   :  { %s1732_s9 = smov 0   ;;  %s1734_s10 = smov 0  }
  0x12   :  { %s1736_s11 = smov 0   ;;  %s1738_s12 = smov 0  }
  0x13   :  { %s1740_s13 = smov 0   ;;  %s1742_s14 = smov 0  }
  0x14   :  { %s1744_s15 = smov 0   ;;  %s1746_s16 = smov 0  }
  0x15   :  { %s1748_s17 = smov 0   ;;  %s1750_s18 = smov 0  }
  0x16 LB: > { %2308 = sst [smem:[#allocation20_spill]] %s1613_s27  ;;  %s1793_s19 = sadd.s32 4294967295, %s1665_s18   ;;  %s1665_s18 = sphi %s1750_s18, %s31_s18   ;;  %s1661_s17 = sphi %s1748_s17, %s2380_s17   ;;  %s1657_s16 = sphi %s1746_s16, %s2387_s16   ;;  %s1653_s15 = sphi %s1744_s15, %s2378_s15   ;;  %s1649_s14 = sphi %s1742_s14, %s2386_s14   ;;  %s1645_s13 = sphi %s1740_s13, %s2385_s13   ;;  %s1641_s12 = sphi %s1738_s12, %s2384_s12   ;;  %s1637_s11 = sphi %s1736_s11, %s2383_s11   ;;  %s1633_s10 = sphi %s1734_s10, %s2382_s10   ;;  %s1629_s9 = sphi %s1732_s9, %s2381_s9   ;;  %s1625_s30 = sphi %s1730_s30, %s2375_s30   ;;  %s1621_s29 = sphi %s1728_s29, %s2374_s29   ;;  %s1617_s28 = sphi %s1726_s28, %s2373_s28   ;;  %s1613_s27 = sphi %s1724_s27, %s2372_s27  }
  0x17   : > { %2309 = sst [smem:[#allocation21_spill]] %s1617_s28  ;;  %s1045_s20 = sadd.s32 4294967294, %s1665_s18  }
  0x18   : > { %2310 = sst [smem:[#allocation22_spill]] %s1621_s29  ;;  %p2272_p0 = scmp.eq.s32.totalorder %s1793_s19, 0 }
  0x19   : > { %2311 = sst [smem:[#allocation23_spill]] %s1629_s9  ;;  %p210_p1 = scmp.ne.s32.totalorder %s1629_s9, %s1625_s30 }
  0x1a   : > { %2312 = sst [smem:[#allocation24_spill]] %s1649_s14  ;;  %p254_p2 = scmp.ne.s32.totalorder %s1621_s29, %s1617_s28 }
  0x1b   : > { %2313 = sst [smem:[#allocation25_spill]] %s1653_s15  ;;  %p255_p3 = scmp.eq.s32.totalorder %s1793_s19, 7 }
  0x1c   : > { %2314 = sst [smem:[#allocation26_spill]] %s1661_s17  ;;  %p1803_p4 = por %p210_p1, %p2272_p0 }
  0x1d   : > { %2315 = sst [smem:[#allocation27_spill]] %s1665_s18  ;;  %p260_p5 = scmp.ne.s32.totalorder %s1617_s28, %s1613_s27 }
  0x1e   : > { %s2316_s21 = scalar_select %p1803_p4, 1, 0 }
  0x1f   : > { %p1809_p6 = por %p255_p3, %p254_p2  ;;  %p261_p7 = scmp.eq.s32.totalorder %s1045_s20, 7 }
  0x20   : > { %2317 = sst [smem:[#allocation28_spill]] %s2316_s21  ;;  %p1046_p8 = scmp.ge.s32.totalorder %s1665_s18, 1 }
  0x21   : > { %s2318_s22 = scalar_select %p1809_p6, 1, 0 }
  0x22   : > { %p268_p9 = scmp.lt.s32.totalorder %s1665_s18, 9  ;;  %p1815_p10 = por %p261_p7, %p260_p5 }
  0x23   : > { %2319 = sst [smem:[#allocation29_spill]] %s2318_s22  ;;  %s1667_s25 = smov [#allocation9]  }
  0x24   : > { %s2320_s23 = scalar_select %p1815_p10, 1, 0 }
  0x25   : > { %p1819_p11 = pnand %p1046_p8, %p268_p9  ;;  %s280_s26 = sshll.u32 %s1667_s25, 4  ;;  %s281_s26 = int_to_ptr.vmem [resolvable:$true] %s280_s26 }
  0x26   : > { %2321 = sst [smem:[#allocation30_spill]] %s2320_s23  ;;  %s2324_s3 = sld [smem:[#allocation37_spill]] }
  0x27   : > { %s2322_s24 = scalar_select %p1819_p11, 1, 0 }
  0x28   : > { %p1170_p12 = pneg %p1819_p11 }
  0x2a   : > { %p1827_p13 = pnand %p1170_p12, %p2272_p0 }
  0x2c   : > { %s2323_s30 = scalar_select %p1827_p13, 1, 0 }
  0x2d   : > { %s1331_s23 = scalar_lea.hbm %s2324_s3, 256  ;;  %p2290_p2 = pneg %p1827_p13 }
  0x2e   : > { %p1332_p1 = scmp.ne.s32.totalorder %s2324_s3, %s1331_s23  ;;  %p1338_p7 = scmp.lt.u32.totalorder %s1331_s23, %s2324_s3 }
  0x30   : > { %p1334_p3 = pnand %p2290_p2, %p1332_p1 }
  0x32   : > { %p1335_p5 = pneg %p1334_p3 }
  0x34   : > { %p1340_p8 = pnand %p1338_p7, %p1335_p5 }
  0x36   : > { %1343 = shalt.err (!%p1340_p8)
}
  0x37   : > { %s1344_s27 = scalar_lea.vmem %s281_s26, 256  ;;  %p1352_p10 = scmp.lt.s32.totalorder %s281_s26, %s281_s26 }
  0x38   : > { %p1345_p9 = scmp.ne.s32.totalorder %s281_s26, %s1344_s27  ;;  %p1353_p6 = scmp.lt.s32.totalorder %s1344_s27, %s1344_s27 }
  0x3a   : > { %p1347_p12 = pnand %p1345_p9, %p2290_p2  ;;  %p1354_p4 = por %p1353_p6, %p1352_p10 }
  0x3c   : > { %p1348_p0 = pneg %p1347_p12 }
  0x3e   : > { %p1355_p11 = pnand %p1354_p4, %p1348_p0 }
  0x40   : > { %1358 = shalt.err (!%p1355_p11)
}
  0x41   : > { %s2276_s8 = smov 64   ;;  %s2278_s15 = smov 4  }
  0x42   : > { %1173 = dma.hbm_to_vmem [thread:$0]  (!%p1827_p13), %s2324_s3, 256, %s281_s26, [#allocation10], %s2276_s8, %s2276_s8, %s2278_s15  }
  0x43   : > { %s40_s20 = sadd.s32 1, %s1657_s16  ;;  %s43_s25 = sadd.s32 1, %s1661_s17 }
  0x44   : > { %p41_p0 = scmp.ge.s32.totalorder %s40_s20, 4  ;;  %s52_s27 = sadd.s32 1, %s1645_s13 }
  0x45   : > { %p59_p4 = scmp.ne.s32.totalorder %s1645_s13, %s1641_s12  ;;  %p60_p6 = scmp.eq.s32.totalorder %s1665_s18, 0 }
  0x46   : > { %s2389_s20 = smov (%p41_p0, %s40_s20), 0  ;;  %s2391_s25 = smov (!%p41_p0, %s43_s25), %s1661_s17 }
  0x47   : > { %2325 = sst [smem:[#allocation31_spill]] %s2389_s20  ;;  %s48_s7 = ssub.s32 %s1657_s16, %s2389_s20 }
  0x48   : > { %p1869_p10 = por %p60_p6, %p59_p4  ;;  %p45_p11 = scmp.ge.s32.totalorder %s2391_s25, 2 }
  0x49   : > { %p65_p1 = scmp.ne.s32.totalorder %s1641_s12, %s1637_s11  ;;  %p195_p3 = scmp.eq.s32.totalorder %s48_s7, 0 }
  0x4a   : > { %s197_s22 = sadd.s32 1, %s1633_s10  ;;  %s2393_s25 = smov (%p45_p11, %s2391_s25), 0 }
  0x4b   : > { %2327 = sst [smem:[#allocation32_spill]] %s2393_s25  ;;  %p2328_p5 = scmp.eq.s32.totalorder %s1793_s19, 0 }
  0x4c   : > { %p204_p8 = scmp.ne.s32.totalorder %s1633_s10, %s1629_s9  ;;  %s47_s8 = ssub.s32 %s1661_s17, %s2393_s25 }
  0x4d   : > { %p1880_p7 = por %p2328_p5, %p65_p1  ;;  %s244_s15 = sadd.s32 1, %s1621_s29 }
  0x4e   : > { %s49_s11 = sor.u32 %s48_s7, %s47_s8  ;;  %p1891_p9 = por %p204_p8, %p60_p6 }
  0x4f   : > { %s2329_s23 = scalar_select %p1880_p7, 1, 0 }
  0x50   : > { %p50_p12 = scmp.eq.s32.totalorder %s49_s11, 0  ;;  %p242_p0 = scmp.eq.s32.totalorder %s47_s8, 0 }
  0x51   : > { %s1896_s20 = scalar_select %p195_p3, %s1633_s10, %s197_s22  }
  0x52   : > { %s1899_s5 = scalar_select %p50_p12, %s1645_s13, %s52_s27  }
  0x53   : > { %2331 = sst [smem:[#allocation33_spill]] %s1896_s20  ;;  %p1196_p4 = scmp.lt.s32.totalorder %s1665_s18, 8 }
  0x54   : > { %2332 = sst [smem:[#allocation34_spill]] %s1899_s5  ;;  %s2288_s28 = sand.u32 1, %s1645_s13  }
  0x55   : > { %s1902_s14 = scalar_select %p242_p0, %s1621_s29, %s244_s15  }
  0x56   : > { %s1908_s25 = sshll.u32 %s2288_s28, 2  ;;  %s1051_s7 = sshll.u32 %s1661_s17, 2 }
  0x57   : > { %2333 = sst [smem:[#allocation35_spill]] %s1902_s14  ;;  %s322_s21 = sadd.s32 %s1657_s16, %s1051_s7 }
  0x58   : > { %p1914_p6 = pnand %p1196_p4, %p1869_p10  ;;  %s1918_s8 = sshll.u32 %s322_s21, 6 }
  0x59   : > { %s333_s27 = sand.u32 1, %s1665_s18   ;;  %s2335_s1 = sld [smem:[#allocation36_spill]] }
  0x5a   : > { %s2334_s9 = scalar_select %p1914_p6, 1, 0 }
  0x5b   : > { %s337_s7 = scalar_lea.vmem [#allocation6], %s1908_s25  ;;  %p1930_p10 = pnand %p1196_p4, %p1891_p9 }
  0x5c   : > { %s346_s26 = sshll.u32 %s337_s7, 4  ;;  %s1936_s21 = scalar_lea.sflag [#allocation7], %s333_s27  ;;  %s1934_s26 = int_to_ptr.vmem [resolvable:$true] %s346_s26 }
  0x5d   : > { %s2336_s28 = scalar_select %p1930_p10, 1, 0 }
  0x5e   : > { %p1942_p1 = pneg %p1914_p6 }
  0x5f   : > { %s1925_s11 = scalar_lea.hbm %s2335_s1, %s1918_s8  ;;  %s1364_s7 = scalar_lea.hbm %s2335_s1, 512 }
  0x60   : > { %s1359_s17 = scalar_lea.hbm %s1925_s11, 64  ;;  %p1365_p8 = scmp.lt.u32.totalorder %s1925_s11, %s2335_s1 }
  0x61   : > { %p1360_p11 = scmp.ne.s32.totalorder %s1925_s11, %s1359_s17  ;;  %p1366_p9 = scmp.lt.u32.totalorder %s1364_s7, %s1359_s17 }
  0x62   : > { %s2337_s15 = scalar_select %p1942_p1, 1, 0 }
  0x63   : > { %p1362_p3 = pnand %p1942_p1, %p1360_p11  ;;  %p1367_p12 = por %p1366_p9, %p1365_p8 }
  0x64   : > { %p1368_p0 = scmp.lt.u32.totalorder %s1359_s17, %s1925_s11 }
  0x65   : > { %p1363_p5 = pneg %p1362_p3 }
  0x66   : > { %p1369_p4 = por %p1368_p0, %p1367_p12 }
  0x68   : > { %p1370_p2 = pnand %p1369_p4, %p1363_p5 }
  0x6a   : > { %1373 = shalt.err (!%p1370_p2)
}
  0x6b   : > { %s1374_s27 = scalar_lea.vmem %s1934_s26, 64  ;;  %s1670_s3 = smov [#allocation6]  }
  0x6c   : > { %p1375_p11 = scmp.ne.s32.totalorder %s1934_s26, %s1374_s27  ;;  %s1379_s22 = sshll.u32 %s1670_s3, 4  ;;  %s1380_s22 = int_to_ptr.vmem [resolvable:$false] %s1379_s22 }
  0x6d   : > { %s1381_s5 = scalar_lea.vmem %s1380_s22, 128  ;;  %p1382_p10 = scmp.lt.s32.totalorder %s1934_s26, %s1380_s22 }
  0x6e   : > { %p1377_p3 = pnand %p1375_p11, %p1942_p1  ;;  %p1383_p13 = scmp.lt.s32.totalorder %s1381_s5, %s1374_s27 }
  0x70   : > { %p1378_p7 = pneg %p1377_p3  ;;  %p1384_p8 = por %p1383_p13, %p1382_p10 }
  0x72   : > { %p1385_p9 = pnand %p1384_p8, %p1378_p7 }
  0x74   : > { %1388 = shalt.err (!%p1385_p9)
}
  0x75   : > { %1183 = dma.hbm_to_vmem [thread:$0]  (!%p1914_p6), %s1925_s11, 64, %s1934_s26, %s1936_s21  }
  0x76   : > { %s1671_s17 = smov [#allocation11]   ;;  %s2338_s4 = sld [smem:[#allocation38_spill]] }
  0x77   : > { %s293_s20 = sshll.u32 %s1671_s17, 4  ;;  %p2339_p2 = scmp.ne.s32.totalorder %s2323_s30, 0  ;;  %s294_s20 = int_to_ptr.vmem [resolvable:$true] %s293_s20 }
  0x79   : > { %p2340_p7 = pneg %p2339_p2 }
  0x7c   : > { %s1389_s3 = scalar_lea.hbm %s2338_s4, 256 }
  0x7d   : > { %p1390_p13 = scmp.ne.s32.totalorder %s2338_s4, %s1389_s3  ;;  %p1396_p12 = scmp.lt.u32.totalorder %s1389_s3, %s2338_s4 }
  0x7f   : > { %p1392_p10 = pnand %p1390_p13, %p2340_p7 }
  0x81   : > { %p1393_p5 = pneg %p1392_p10 }
  0x83   : > { %p1398_p0 = pnand %p1396_p12, %p1393_p5 }
  0x85   : > { %1401 = shalt.err (!%p1398_p0)
}
  0x86   : > { %s1402_s11 = scalar_lea.vmem %s294_s20, 256  ;;  %p2341_p11 = pmov %p2340_p7 }
  0x87   : > { %p1403_p4 = scmp.ne.s32.totalorder %s294_s20, %s1402_s11  ;;  %p1410_p9 = scmp.lt.s32.totalorder %s294_s20, %s294_s20 }
  0x88   : > { %p1411_p6 = scmp.lt.s32.totalorder %s1402_s11, %s1402_s11 }
  0x89   : > { %p1405_p3 = pnand %p1403_p4, %p2341_p11 }
  0x8a   : > { %p1412_p1 = por %p1411_p6, %p1410_p9 }
  0x8b   : > { %p1406_p8 = pneg %p1405_p3 }
  0x8d   : > { %p1413_p7 = pnand %p1412_p1, %p1406_p8 }
  0x8f   : > { %1416 = shalt.err (!%p1413_p7)
}
  0x90   : > { %s2342_s1 = smov 4   ;;  %s2343_s14 = smov 64  }
  0x91   : > { %1176 = dma.hbm_to_vmem [thread:$0]  (!%p2339_p2), %s2338_s4, 256, %s294_s20, [#allocation10], %s2343_s14, %s2343_s14, %s2342_s1  }
  0x92   : > { %s1993_s22 = scalar_lea.hbm %s2258_s0, %s1918_s8  ;;  %s317_s30 = scalar_lea.vmem [#allocation3], %s1908_s25 }
  0x93   : > { %s326_s27 = sshll.u32 %s317_s30, 4  ;;  %s2002_s26 = scalar_lea.hbm %s2260_s2, %s1918_s8  ;;  %s1996_s27 = int_to_ptr.vmem [resolvable:$true] %s326_s27 }
  0x94   : > { %s2344_s17 = sand.u32 1, %s1645_s13   ;;  %s1417_s4 = scalar_lea.hbm %s1993_s22, 64 }
  0x95   : > { %s314_s20 = scalar_lea.sflag [#allocation4], %s2344_s17  ;;  %p1418_p6 = scmp.ne.s32.totalorder %s1993_s22, %s1417_s4 }
  0x96   : > { %p2345_p1 = scmp.ne.s32.totalorder %s2337_s15, 0  ;;  %s1422_s29 = scalar_lea.hbm %s2258_s0, 512 }
  0x97   : > { %p1423_p10 = scmp.lt.u32.totalorder %s1993_s22, %s2258_s0  ;;  %p1424_p5 = scmp.lt.u32.totalorder %s1422_s29, %s1417_s4 }
  0x98   : > { %p1420_p13 = pnand %p1418_p6, %p2345_p1  ;;  %p1426_p0 = scmp.lt.u32.totalorder %s1417_s4, %s1993_s22 }
  0x99   : > { %p1425_p12 = por %p1424_p5, %p1423_p10 }
  0x9a   : > { %p1421_p2 = pneg %p1420_p13 }
  0x9b   : > { %p1427_p4 = por %p1426_p0, %p1425_p12 }
  0x9d   : > { %p1428_p11 = pnand %p1427_p4, %p1421_p2 }
  0x9f   : > { %1431 = shalt.err (!%p1428_p11)
}
  0xa0   : > { %s1432_s8 = scalar_lea.vmem %s1996_s27, 64  ;;  %s1672_s5 = smov [#allocation3]  }
  0xa1   : > { %p1433_p3 = scmp.ne.s32.totalorder %s1996_s27, %s1432_s8  ;;  %s1437_s11 = sshll.u32 %s1672_s5, 4  ;;  %s1438_s11 = int_to_ptr.vmem [resolvable:$false] %s1437_s11 }
  0xa2   : > { %s1439_s18 = scalar_lea.vmem %s1438_s11, 128  ;;  %p1440_p7 = scmp.lt.s32.totalorder %s1996_s27, %s1438_s11 }
  0xa3   : > { %p1435_p8 = pnand %p1433_p3, %p2345_p1  ;;  %p1441_p6 = scmp.lt.s32.totalorder %s1439_s18, %s1432_s8 }
  0xa5   : > { %p1436_p9 = pneg %p1435_p8  ;;  %p1442_p13 = por %p1441_p6, %p1440_p7 }
  0xa7   : > { %p1443_p10 = pnand %p1442_p13, %p1436_p9 }
  0xa9   : > { %1446 = shalt.err (!%p1443_p10)
}
  0xaa   : > { %p2346_p2 = scmp.ne.s32.totalorder %s2334_s9, 0  ;;  %s357_s4 = scalar_lea.vmem [#allocation8], %s1908_s25 }
  0xab   : > { %s366_s29 = sshll.u32 %s357_s4, 4  ;;  %s373_s17 = sand.u32 1, %s1633_s10   ;;  %s367_s29 = int_to_ptr.vmem [resolvable:$true] %s366_s29 }
  0xac   : > { %1180 = dma.hbm_to_vmem [thread:$0]  (!%p2346_p2), %s1993_s22, 64, %s1996_s27, %s314_s20  }
  0xad   : > { %s1447_s7 = scalar_lea.hbm %s2002_s26, 64  ;;  %s1452_s8 = scalar_lea.hbm %s2260_s2, 512 }
  0xae   : > { %p1448_p5 = scmp.ne.s32.totalorder %s2002_s26, %s1447_s7  ;;  %p1453_p4 = scmp.lt.u32.totalorder %s2002_s26, %s2260_s2 }
  0xaf   : > { %p1454_p11 = scmp.lt.u32.totalorder %s1452_s8, %s1447_s7  ;;  %p1456_p8 = scmp.lt.u32.totalorder %s1447_s7, %s2002_s26 }
  0xb0   : > { %p1450_p12 = pnand %p1448_p5, %p2345_p1 }
  0xb1   : > { %p1455_p3 = por %p1454_p11, %p1453_p4 }
  0xb2   : > { %p1451_p0 = pneg %p1450_p12 }
  0xb3   : > { %p1457_p9 = por %p1456_p8, %p1455_p3 }
  0xb5   : > { %p1458_p7 = pnand %p1457_p9, %p1451_p0 }
  0xb7   : > { %1461 = shalt.err (!%p1458_p7)
}
  0xb8   : > { %s1462_s25 = scalar_lea.vmem %s367_s29, 64  ;;  %s1673_s22 = smov [#allocation8]  }
  0xb9   : > { %p1463_p6 = scmp.ne.s32.totalorder %s367_s29, %s1462_s25  ;;  %s1467_s27 = sshll.u32 %s1673_s22, 4  ;;  %s1468_s27 = int_to_ptr.vmem [resolvable:$false] %s1467_s27 }
  0xba   : > { %s1469_s20 = scalar_lea.vmem %s1468_s27, 128  ;;  %p1470_p5 = scmp.lt.s32.totalorder %s367_s29, %s1468_s27 }
  0xbb   : > { %p1465_p13 = pnand %p1463_p6, %p2345_p1  ;;  %p1471_p12 = scmp.lt.s32.totalorder %s1469_s20, %s1462_s25 }
  0xbd   : > { %p1466_p10 = pneg %p1465_p13  ;;  %p1472_p2 = por %p1471_p12, %p1470_p5 }
  0xbf   : > { %p1473_p4 = pnand %p1472_p2, %p1466_p10 }
  0xc1   : > { %1476 = shalt.err (!%p1473_p4)
}
  0xc2   : > { %p2347_p11 = scmp.ne.s32.totalorder %s2334_s9, 0  ;;  %s1059_s15 = sshll.u32 %s373_s17, 4 }
  0xc3   : > { %s1091_s18 = sshll.u32 %s1657_s16, 8  ;;  %s377_s9 = scalar_lea.vmem [#allocation12], %s1059_s15 }
  0xc4   : > { %1186 = dma.hbm_to_vmem [thread:$0]  (!%p2347_p11), %s2002_s26, 64, %s367_s29, %s1936_s21  }
  0xc5   : > { %s2053_s3 = scalar_lea.hbm %s2264_s6, %s1091_s18  ;;  %s384_s30 = sshll.u32 %s377_s9, 4  ;;  %s2055_s30 = int_to_ptr.vmem [resolvable:$true] %s384_s30 }
  0xc6   : > { %s2059_s8 = scalar_lea.sflag [#allocation13], %s373_s17  ;;  %s1477_s21 = scalar_lea.hbm %s2053_s3, 256 }
  0xc7   : > { %p1478_p1 = scmp.ne.s32.totalorder %s2053_s3, %s1477_s21  ;;  %p2348_p2 = scmp.ne.s32.totalorder %s2336_s28, 0 }
  0xc8   : > { %s1482_s5 = scalar_lea.hbm %s2264_s6, 1024  ;;  %p1483_p9 = scmp.lt.u32.totalorder %s2053_s3, %s2264_s6 }
  0xc9   : > { %p1479_p0 = pneg %p2348_p2  ;;  %p1484_p7 = scmp.lt.u32.totalorder %s1482_s5, %s1477_s21 }
  0xca   : > { %p1486_p13 = scmp.lt.u32.totalorder %s1477_s21, %s2053_s3 }
  0xcb   : > { %p1480_p3 = pnand %p1479_p0, %p1478_p1  ;;  %p1485_p6 = por %p1484_p7, %p1483_p9 }
  0xcd   : > { %p1481_p8 = pneg %p1480_p3  ;;  %p1487_p10 = por %p1486_p13, %p1485_p6 }
  0xcf   : > { %p1488_p5 = pnand %p1487_p10, %p1481_p8 }
  0xd1   : > { %1491 = shalt.err (!%p1488_p5)
}
  0xd2   : > { %s1492_s17 = scalar_lea.vmem %s2055_s30, 256  ;;  %s1674_s22 = smov [#allocation12]  }
  0xd3   : > { %p1493_p12 = scmp.ne.s32.totalorder %s2055_s30, %s1492_s17  ;;  %s1497_s27 = sshll.u32 %s1674_s22, 4  ;;  %s1498_s27 = int_to_ptr.vmem [resolvable:$false] %s1497_s27 }
  0xd4   : > { %s1499_s20 = scalar_lea.vmem %s1498_s27, 512  ;;  %p1500_p1 = scmp.lt.s32.totalorder %s2055_s30, %s1498_s27 }
  0xd5   : > { %p1495_p4 = pnand %p1493_p12, %p1479_p0  ;;  %p1501_p3 = scmp.lt.s32.totalorder %s1499_s20, %s1492_s17 }
  0xd7   : > { %p1496_p11 = pneg %p1495_p4  ;;  %p1502_p9 = por %p1501_p3, %p1500_p1 }
  0xd9   : > { %p1503_p7 = pnand %p1502_p9, %p1496_p11 }
  0xdb   : > { %1506 = shalt.err (!%p1503_p7)
}
  0xdc   : > { %1189 = dma.hbm_to_vmem [thread:$0]  (!%p2348_p2), %s2053_s3, 256, %s2055_s30, %s2059_s8, %s2343_s14, %s2343_s14, %s2342_s1  }
  0xdd   : > { %p2349_p0 = scmp.ne.s32.totalorder %s2322_s24, 0 }
  0xde   : > { %s398_s15 = sand.u32 (!%p2349_p0), 1, %s1641_s12   ;;  %p2350_p8 = scmp.ne.s32.totalorder (!%p2349_p0), %s2329_s23, 0 }
  0xdf   : > { %396 = sbr.rel (%p2349_p0) target bundleno = 1488 (0x5d0), region = 52  ;;  %s2093_s18 = sshll.u32 (!%p2349_p0), %s398_s15, 2 }
  0xe0   : > { %s399_s4 = scalar_lea.sflag (!%p2349_p0), [#allocation4], %s398_s15  ;;  %s402_s7 = scalar_lea.vmem (!%p2349_p0), [#allocation3], %s2093_s18 }
  0xe6   : > { %1592 = dma.done.wait (%p2350_p8), %s399_s4, 64  }
  0xe7   : > { %1594 = vsyncadd (%p2350_p8), %s399_s4, 4294967232  ;;  %s407_s28 = sand.u32 1, %s1793_s19   ;;  %s411_s24 = scalar_lea.vmem [#allocation6], %s2093_s18 }
  0xe8   : > { %s408_s1 = scalar_lea.sflag [#allocation7], %s407_s28 }
  0xe9   : > { %1596 = dma.done.wait (%p2350_p8), %s408_s1, 128  }
  0xea   : > { %1598 = vsyncadd (%p2350_p8), %s408_s1, 4294967168  ;;  %s420_s14 = scalar_lea.vmem [#allocation8], %s2093_s18  ;;  %p2351_p2 = scmp.eq.s32.totalorder %s1793_s19, 0 }
  0xec   : > { %1600 = dma.done.wait (%p2351_p2), [#allocation10], 512   ;;  %p2352_p6 = pmov %p2351_p2 }
  0xed   : > { %s2353_s3 = sld [smem:[#allocation23_spill]]  ;;  %s2354_s9 = sld [smem:[#allocation28_spill]] }
  0xee   : > { %1602 = vsyncadd (%p2352_p6), [#allocation10], 4294966784 }
  0xf3   : > { %s433_s30 = sand.u32 1, %s2353_s3   ;;  %p2355_p13 = scmp.ne.s32.totalorder %s2354_s9, 0 }
  0xf4   : > { %s2112_s8 = sshll.u32 %s433_s30, 4  ;;  %s434_s21 = scalar_lea.sflag [#allocation13], %s433_s30 }
  0xf5   : > { %s437_s26 = scalar_lea.vmem [#allocation12], %s2112_s8 }
  0xf6   : > { %1604 = dma.done.wait (%p2355_p13), %s434_s21, 256  }
  0xf7   : > { %1606 = vsyncadd (%p2355_p13), %s434_s21, 4294967040  ;;  %s2356_s23 = sld [smem:[#allocation21_spill]]  ;;  %s2357_s11 = sld [smem:[#allocation24_spill]] }
  0xfd   : > { %s482_s29 = sand.u32 1, %s2356_s23   ;;  %p1070_p10 = scmp.ne.s32.totalorder %s2357_s11, 0 }
  0xfe   : > { %s2122_s5 = sshll.u32 %s482_s29, 3  ;;  %v1675_v0 = vmov (!%p1070_p10), 0.0  }
  0xff   : > { %s484_s19 = scalar_lea.vmem [#allocation14], %s2122_s5  ;;  %489 = sbr.rel (%p1070_p10) target bundleno = 262 (0x106), region = 80  ;;  %490 = vst [vmem:[#allocation2] sm:$0xff] (!%p1070_p10), %v1675_v0 }
 0x106 PF: > { %v1319_v1 = vld [vmem:[#allocation9] sm:$0xff]   ;;  %v1676_v2 = vmov 0.0   ;;  %v1320_v3 = vld [vmem:[#allocation11] sm:$0xff]   ;;  %v1321_v4 = vld [vmem:[#allocation9 + $0x8] sm:$0xff]   ;;  %vm1677_vm0 = vmmov 0   ;;  %vm508_vm1 = vcmask 261120  }
 0x107   : > { %1108 = vmatprep.subr.bf16.mxu0 %v1676_v2  ;;  %1116 = vmatprep.subr.bf16.mxu1 %v1676_v2  ;;  %v1322_v5 = vld [vmem:[#allocation11 + $0x8] sm:$0xff]   ;;  %v491_v6 = vld [vmem:[%s402_s7] sm:$0xf]  ;;  %v552_v7 = vld [vmem:[%s411_s24] sm:$0xf]  ;;  %s2358_s22 = sld [smem:[#allocation39_spill]] }
 0x108   : > { %1109 = vmatpush3.bf16.msra.mxu0 %v1319_v1  ;;  %1112 = vmatprep.mubr.msk.bf16.mxu0 %vm1677_vm0, %v1676_v2  ;;  %v612_v10 = vld [vmem:[%s420_s14] sm:$0xf]  ;;  %vm737_vm2 = vcmask 1043456   ;;  %vm721_vm3 = vcmask 64512   ;;  %v1325_v38 = vld [vmem:[%s437_s26] sm:$0xff]   ;;  %s2359_s15 = sld [smem:[#allocation24_spill]] }
 0x109   : > { %1117 = vmatpush3.bf16.msra.mxu1 %v1320_v3  ;;  %1110 = vmatprep.subr.bf16.mxu0 %v1676_v2  ;;  %v1326_v43 = vld [vmem:[%s437_s26 + $0x8] sm:$0xff]   ;;  %v841_v49 = vld [vmem:[#allocation2] sm:$0xff] }
 0x10a   : > { %1118 = vmatprep.subr.bf16.mxu1 %v1676_v2  ;;  %1120 = vmatprep.mubr.msk.bf16.mxu1 %vm1677_vm0, %v1676_v2 }
 0x10c   : > { %1111 = vmatpush3.bf16.msra.mxu0 %v1321_v4 }
 0x10d   : > { %v1323_v8 = vld [vmem:[%s2358_s22] sm:$0xff]   ;;  %1119 = vmatpush3.bf16.msra.mxu1 %v1322_v5  ;;  %1124 = vmatprep.subr.bf16.mxu0 %v1676_v2  ;;  %v1324_v9 = vld [vmem:[%s2358_s22 + $0x8] sm:$0xff]  }
 0x10e   : > { %1132 = vmatprep.subr.bf16.mxu1 %v1676_v2  ;;  %p1085_p5 = scmp.ne.s32.totalorder %s2359_s15, 3 }
 0x10f   : > { %1113 = vmatmul.mubr.msk.bf16.vlgmr.msra.gmra.mrb[0].mxu0 %vm508_vm1, %v491_v6  ;;  %s2360_s7 = sld [smem:[#allocation40_spill]] (!%p1085_p5) }
 0x110   : > { %1121 = vmatmul.mubr.msk.bf16.vlgmr.msra.gmra.mrb[0].mxu1 %vm508_vm1, %v552_v7  ;;  %1125 = vmatpush3.bf16.msra.mxu0 %v1323_v8 }
 0x111   : > { %1126 = vmatprep.subr.bf16.mxu0 %v1676_v2  ;;  %1128 = vmatprep.mubr.msk.bf16.mxu0 %vm1677_vm0, %v1676_v2 }
 0x112   : > { %1134 = vmatprep.mubr.msk.bf16.mxu1 %vm1677_vm0, %v1676_v2 }
 0x114   : > { %1127 = vmatpush3.bf16.msra.mxu0 %v1324_v9 }
 0x115   : > { %1138 = vmatprep.subr.bf16.mxu0 %v1676_v2  ;;  %v1086_v56 = vld [vmem:[%s2360_s7] ss:$0 sm:$0xff] (!%p1085_p5) }
 0x117   : > { %1129 = vmatmul.mubr.msk.bf16.vlgmr.msra.gmra.mrb[4].mxu0 %vm508_vm1, %v612_v10 }
 0x118   : > { %1140 = vmatprep.mubr.msk.bf16.mxu0 %vm1677_vm0, %v1676_v2 }
 0x1e2   : > { %v546_v11 = vpop.f32.mrb[0].mxu0 }
 0x1e3   : > { %v674_v12 = vpack.c.bf16 %v546_v11, %v546_v11  ;;  %v606_v13 = vpop.f32.mrb[0].mxu1  ;;  %v1114_v14 = vpop.f32.mrb[1].mxu0 }
 0x1e4   : > { %v673_v15 = vpack.c.bf16 %v606_v13, %v606_v13  ;;  %v1122_v16 = vpop.f32.mrb[1].mxu1  ;;  %v549_v17 = vpop.f32.mrb[2].mxu0 }
 0x1e5   : > { %v739_v18 = vsel %vm737_vm2, %v674_v12, 0  ;;  %v609_v19 = vpop.f32.mrb[2].mxu1  ;;  %v1115_v20 = vpop.f32.mrb[3].mxu0 }
 0x1e6   : > { %v679_v21 = vsel %vm508_vm1, %v673_v15, 0  ;;  %v1123_v22 = vpop.f32.mrb[3].mxu1  ;;  %1139 = vmatpush3.bf16.msra.mxu0 %v739_v18 }
 0x1e7   : > { %1133 = vmatpush3.bf16.xpose.msra.mxu1 %v679_v21 }
 0x1e8   : > { %1144 = vmatprep.subr.bf16.mxu1 %v1676_v2 }
 0x1ea   : > { %v666_v23 = vpop.f32.mrb[4].mxu0 }
 0x1eb   : > { %v672_v24 = vpack.c.bf16 %v666_v23, %v666_v23  ;;  %v1130_v25 = vpop.f32.mrb[5].mxu0 }
 0x1ec   : > { %v669_v26 = vpop.f32.mrb[6].mxu0 }
 0x1ed   : > { %v1131_v27 = vpop.f32.mrb[7].mxu0 }
 0x1ee   : > { %1135 = vmatmul.mubr.msk.bf16.vlgmr.msra.gmra.mrb[4].mxu1 %vm508_vm1, %v672_v24 }
 0x1ef   : > { %1148 = vmatprep.mubr.msk.bf16.mxu1 %vm1677_vm0, %v1676_v2  ;;  %1145 = vmatpush3.bf16.msra.mxu1 %v1325_v38 }
 0x1f0   : > { %1146 = vmatprep.subr.bf16.mxu1 %v1676_v2 }
 0x1f3   : > { %1147 = vmatpush3.bf16.msra.mxu1 %v1326_v43 }
 0x2c1   : > { %v715_v28 = vpop.f32.mrb[4].mxu1 }
 0x2c2   : > { %v1136_v29 = vpop.f32.mrb[5].mxu1  ;;  %v722_v30 = vsel %vm721_vm3, %v715_v28, -inf }
 0x2c3   : > { %723 = vmax.xlane.f32.xlu0 %v722_v30  ;;  %v718_v31 = vpop.f32.mrb[6].mxu1 }
 0x2c4   : > { %v1137_v32 = vpop.f32.mrb[7].mxu1 }
 0x350   : > { %v724_v33 = vpop.xlane.xlu0 %723 }
 0x351   : > { %v725_v34 = vsub.f32 %v715_v28, %v724_v33 }
 0x353   : > { %v726_v35 = vmul.f32 1.442695, %v725_v34 }
 0x355   : > { %1327 = vpow2.f32 %v726_v35 }
 0x35f   : > { %v1328_v36 = vpop.eup %1327 }
 0x360   : > { %v728_v37 = vsel %vm721_vm3, %v1328_v36, 0.0 }
 0x361   : > { %729 = vadd.xlane.f32.xlu0 %v728_v37 }
 0x3ee   : > { %v730_v39 = vpop.xlane.xlu0 %729 }
 0x3ef   : > { %1329 = vrcp.f32 %v730_v39 }
 0x3f9   : > { %v1330_v40 = vpop.eup %1329 }
 0x3fa   : > { %v732_v41 = vmul.f32 %v1330_v40, %v1328_v36 }
 0x3fc   : > { %v733_v42 = vpack.c.bf16 %v732_v41, %v732_v41 }
 0x3fe   : > { %1141 = vmatmul.mubr.msk.bf16.vlgmr.msra.gmra.mrb[8].mxu0 %vm721_vm3, %v733_v42 }
 0x4d1   : > { %v775_v44 = vpop.f32.mrb[8].mxu0 }
 0x4d2   : > { %v781_v45 = vpack.c.bf16 %v775_v44, %v775_v44  ;;  %v1142_v46 = vpop.f32.mrb[9].mxu0 }
 0x4d3   : > { %v778_v47 = vpop.f32.mrb[10].mxu0 }
 0x4d4   : > { %v1143_v48 = vpop.f32.mrb[11].mxu0  ;;  %1149 = vmatmul.mubr.msk.bf16.vlgmr.msra.gmra.mrb[8].mxu1 %vm508_vm1, %v781_v45 }
 0x5a4   : > { %847 = sbr.rel (%p1085_p5) target bundleno = 1461 (0x5b5), region = 84 }
 0x5a7   : > { %v835_v50 = vpop.f32.mrb[8].mxu1 }
 0x5a8   : > { %v842_v51 = vadd.f32 %v841_v49, %v835_v50  ;;  %v1150_v52 = vpop.f32.mrb[9].mxu1 }
 0x5a9   : > { %v838_v53 = vpop.f32.mrb[10].mxu1 }
 0x5aa   : > { %843 = vst [vmem:[#allocation2] sm:$0xff] %v842_v51  ;;  %v1151_v54 = vpop.f32.mrb[11].mxu1 }
 0x5b1   : > { %v848_v55 = vld [vmem:[#allocation2] sm:$0xff] }
 0x5b2   : > { %v856_v57 = vadd.f32 %v1086_v56, %v848_v55 }
 0x5b4   : > { %857 = vst [vmem:[%s484_s19] sm:$0xff] %v856_v57 }
 0x5b5 PF: > { %s2361_s28 = sld [smem:[#allocation25_spill]]  ;;  %s2363_s24 = sld [smem:[#allocation29_spill]] }
 0x5b6   : > { %s2364_s30 = sld [smem:[#allocation41_spill]]  ;;  %s872_s26 = sshll.u32 %s484_s19, 4  ;;  %s873_s26 = int_to_ptr.vmem [resolvable:$true] %s872_s26 }
 0x5b7   : > { %s859_s23 = scalar_lea.sflag [#allocation5], %s482_s29  ;;  %s1507_s11 = scalar_lea.vmem %s873_s26, 128 }
 0x5b8   : > { %p1508_p12 = scmp.ne.s32.totalorder %s873_s26, %s1507_s11  ;;  %s1678_s25 = smov [#allocation14]  }
 0x5b9   : > { %s1511_s17 = sshll.u32 %s1678_s25, 4  ;;  %s1512_s17 = int_to_ptr.vmem [resolvable:$false] %s1511_s17 }
 0x5ba   : > { %s1513_s27 = scalar_lea.vmem %s1512_s17, 256  ;;  %p1514_p3 = scmp.lt.s32.totalorder %s873_s26, %s1512_s17 }
 0x5bb   : > { %s1088_s14 = sshll.u32 %s2361_s28, 7  ;;  %p2366_p4 = scmp.ne.s32.totalorder %s2363_s24, 0 }
 0x5bc   : > { %s2365_s8 = smov %s2364_s30  ;;  %s2183_s21 = scalar_lea.hbm %s2364_s30, %s1088_s14 }
 0x5bd   : > { %p1509_p11 = pnand %p1508_p12, %p2366_p4  ;;  %p1515_p9 = scmp.lt.s32.totalorder %s1513_s27, %s1507_s11 }
 0x5bf   : > { %p1510_p1 = pneg %p1509_p11  ;;  %p1516_p7 = por %p1515_p9, %p1514_p3 }
 0x5c1   : > { %p1517_p0 = pnand %p1516_p7, %p1510_p1 }
 0x5c3   : > { %1520 = shalt.err (!%p1517_p0)
}
 0x5c4   : > { %s1521_s29 = scalar_lea.hbm %s2183_s21, 128  ;;  %s1525_s20 = scalar_lea.hbm %s2365_s8, 256 }
 0x5c5   : > { %p1522_p8 = scmp.ne.s32.totalorder %s2183_s21, %s1521_s29  ;;  %p1526_p13 = scmp.lt.u32.totalorder %s2183_s21, %s2365_s8 }
 0x5c6   : > { %p1527_p10 = scmp.lt.u32.totalorder %s1525_s20, %s1521_s29  ;;  %p1529_p12 = scmp.lt.u32.totalorder %s1521_s29, %s2183_s21 }
 0x5c7   : > { %p1523_p2 = pnand %p1522_p8, %p2366_p4 }
 0x5c8   : > { %p1528_p5 = por %p1527_p10, %p1526_p13 }
 0x5c9   : > { %p1524_p6 = pneg %p1523_p2 }
 0x5ca   : > { %p1530_p11 = por %p1529_p12, %p1528_p5 }
 0x5cc   : > { %p1531_p1 = pnand %p1530_p11, %p1524_p6 }
 0x5ce   : > { %1534 = shalt.err (!%p1531_p1)
}
 0x5cf   : > { %1168 = dma.vmem_to_hbm [thread:$0]  (%p2366_p4), %s873_s26, 128, %s2183_s21, %s859_s23  }
 0x5d0 PF: > { %s2367_s4 = sld [smem:[#allocation27_spill]]  ;;  %s2368_s7 = sld [smem:[#allocation20_spill]] }
 0x5d1   : > { %s2369_s28 = sld [smem:[#allocation30_spill]] }
 0x5d6   : > { %p1199_p3 = scmp.ge.s32.totalorder %s2367_s4, 2  ;;  %s884_s1 = sand.u32 1, %s2368_s7  }
 0x5d7   : > { %p2370_p9 = scmp.ne.s32.totalorder %s2369_s28, 0  ;;  %s885_s14 = scalar_lea.sflag [#allocation5], %s884_s1 }
 0x5d9   : > { %p1191_p7 = pnand %p1199_p3, %p2370_p9 }
 0x5db   : > { %1608 = dma.done.wait (!%p1191_p7), %s885_s14, 128  }
 0x5dc   : > { %1610 = vsyncadd (!%p1191_p7), %s885_s14, 4294967168  ;;  %s31_s18 = sadd.s32 1, %s2367_s4   ;;  %s2372_s27 = sld [smem:[#allocation21_spill]] }
 0x5dd   : > { %p2211_p0 = scmp.ge.s32.totalorder %s31_s18, 10   ;;  %s2373_s28 = sld [smem:[#allocation22_spill]] }
 0x5de   : > { %s2374_s29 = sld [smem:[#allocation35_spill]]  ;;  %s2375_s30 = sld [smem:[#allocation23_spill]] }
 0x5df   : > { %s2376_s24 = sld [smem:[#allocation33_spill]]  ;;  %s2377_s21 = sld [smem:[#allocation34_spill]] }
 0x5e0   : > { %s2378_s15 = sld [smem:[#allocation26_spill]]  ;;  %s2379_s26 = sld [smem:[#allocation31_spill]] }
 0x5e1   : > { %s2380_s17 = sld [smem:[#allocation32_spill]]  ;;  %s2381_s9 = smov %s1633_s10 }
 0x5e2   : > { %s2383_s11 = smov %s1641_s12  ;;  %s2384_s12 = smov %s1645_s13 }
 0x5e3   : > { %s2386_s14 = smov %s1657_s16  ;;  %30 = sbr.rel (!%p2211_p0) target bundleno = 22 (0x16), region = 150 }
 0x5e5   : > { %s2382_s10 = smov %s2376_s24  ;;  %s2385_s13 = smov %s2377_s21 }
 0x5e6   : > { %s2387_s16 = smov %s2379_s26 }
 0x5ea   :  { %890 = vsyncpa [#allocation4], 1 }
 0x5eb   :  { %892 = vsyncpa [#allocation4 + $0x1], 1 }
 0x5ec   :  { %893 = vsyncpa [#allocation7], 1 }
 0x5ed   :  { %895 = vsyncpa [#allocation7 + $0x1], 1 }
 0x5ee   :  { %896 = vsyncpa [#allocation10], 1 }
 0x5ef   :  { %897 = vsyncpa [#allocation13], 1 }
 0x5f0   :  { %899 = vsyncpa [#allocation13 + $0x1], 1 }
 0x5f1   :  { %900 = vsyncpa [#allocation5], 1 }
 0x5f2   :  { %902 = vsyncpa [#allocation5 + $0x1], 1 }

</bundles_post_ra>
